<compile_context>
chip_gen: v7x
topology: tpu7x:2x2x1
jax: 0.10.0
libtpu: 0.0.40
codegen_flags: <defaults>
</compile_context>

<pallas_src>
import functools

import jax
import jax.numpy as jnp
from jax.experimental import pallas as pl
from jax.experimental.pallas import tpu as pltpu


# ----------------------------------------------------------------------------
# Pallas kernel: one batch tile of the full NeuCF forward (batch in lanes).
# ----------------------------------------------------------------------------
def _neucf_kernel(n_fc, f_mlp, u_ref, i_ref, *refs):
    """refs = (w0_u_t, w0_i_t, b0, [w_k_t, b_k]*, w_aff_mlp, w_aff_mf, b_aff, out).

    Streams: (F_mlp + F_mf, TILE_B) bf16, batch in the lane axis.
    Weights are stored transposed (out_features, in_features); biases (out, 1).
    The affine weight is split into its MLP part (layers[-1], 1) and MF part
    (num_factors_mf, 1).
    """
    out_ref = refs[-1]
    params = refs[:-1]

    # Static ref slices (zero runtime cost): MLP half stays bf16 straight into
    # the MXU; the tiny MF half is upcast so VPU work is f32 (v5e-safe).
    u_mlp = u_ref[:f_mlp, :]                        # (F_mlp, TILE_B) bf16
    i_mlp = i_ref[:f_mlp, :]
    u_mf = u_ref[f_mlp:, :].astype(jnp.float32)     # (F_mf,  TILE_B) f32
    i_mf = i_ref[f_mlp:, :].astype(jnp.float32)

    # First fc layer with the concat fused into two bf16 matmuls (f32 acc).
    w0_u_t = params[0][...]                         # (out0, F_mlp) bf16
    w0_i_t = params[1][...]                         # (out0, F_mlp) bf16
    b0 = params[2][...]                             # (out0, 1)     f32
    h = (jnp.dot(w0_u_t, u_mlp, preferred_element_type=jnp.float32)
         + jnp.dot(w0_i_t, i_mlp, preferred_element_type=jnp.float32)
         + b0)
    h = jnp.maximum(h, 0.0)                         # ReLU after every Linear

    idx = 3
    for _ in range(n_fc - 1):
        w_t = params[idx][...]                      # (out_k, in_k) f32
        b = params[idx + 1][...]                    # (out_k, 1)    f32
        idx += 2
        h = jnp.dot(w_t, h, preferred_element_type=jnp.float32) + b
        h = jnp.maximum(h, 0.0)

    # MF path, fused in-kernel (no HBM intermediate for the product).
    mf = u_mf * i_mf                                # (F_mf, TILE_B) f32

    # Final width-1 affine as VPU mul + sublane reduce -> lane-dense logits.
    w_aff_mlp = params[idx][...]                    # (layers[-1], 1) f32
    w_aff_mf = params[idx + 1][...]                 # (F_mf, 1)       f32
    b_aff = params[idx + 2][...]                    # (1, 1)          f32
    logits = (jnp.sum(h * w_aff_mlp, axis=0, keepdims=True)
              + jnp.sum(mf * w_aff_mf, axis=0, keepdims=True)
              + b_aff)                              # (1, TILE_B)
    out_ref[...] = jax.nn.sigmoid(logits)           # lane-dense store


# ----------------------------------------------------------------------------
# Wrapper: fused embedding gathers (glue) + batch-tiled pallas_call.
# ----------------------------------------------------------------------------
def neucf_forward(user_indices, item_indices, params, *, tile_b=8192):
    """Returns rating of shape (B,).  Sweep tile_b in {4096..32768} at scale."""
    (user_table, item_table, fc_ws, fc_bs, aff_w, aff_b) = params

    f_tot = user_table.shape[1]
    f_mlp = fc_ws[0].shape[0] // 2
    f_mf = f_tot - f_mlp
    l_last = fc_ws[-1].shape[1]
    n_fc = len(fc_ws)

    batch = user_indices.shape[0]
    # Lane-dense tile, >= 128; keep >=2 grid blocks at large batch so v7x's
    # two TensorCores both get work (v5e/v6e are single-TC and unaffected).
    tile_b = max(128, (int(tile_b) // 128) * 128)
    if batch > 2 * 128:
        half = -(-batch // 2)
        half = -(-half // 128) * 128
        tile_b = min(tile_b, half)

    num_blocks = pl.cdiv(batch, tile_b)
    padded_b = num_blocks * tile_b
    pad = padded_b - batch

    u_idx = jnp.pad(user_indices, (0, pad))
    i_idx = jnp.pad(item_indices, (0, pad))

    # One fused gather per side, delivered batch-in-lanes: (F_mlp+F_mf, B).
    u_stream = user_table[u_idx].T                  # bf16 (f_tot, padded_b)
    i_stream = item_table[i_idx].T                  # bf16 (f_tot, padded_b)

    # Batch-in-lanes weight layout (tiny tensors, prepared once per call).
    w0 = fc_ws[0]
    w0_u_t = w0[:f_mlp, :].T.astype(jnp.bfloat16)   # (out0, F_mlp)
    w0_i_t = w0[f_mlp:, :].T.astype(jnp.bfloat16)   # (out0, F_mlp)
    flat = [w0_u_t, w0_i_t, fc_bs[0].reshape(-1, 1)]
    for w, b in zip(fc_ws[1:], fc_bs[1:]):
        flat.extend([w.T, b.reshape(-1, 1)])
    aff_row = aff_w.reshape(-1)
    flat.extend([aff_row[:l_last].reshape(-1, 1),       # (layers[-1], 1)
                 aff_row[l_last:].reshape(-1, 1),        # (F_mf, 1)
                 jnp.asarray(aff_b, jnp.float32).reshape(1, 1)])

    kernel = functools.partial(_neucf_kernel, n_fc, f_mlp)

    stream_spec = pl.BlockSpec((f_tot, tile_b), lambda i: (0, i))

    def const_spec(arr):
        return pl.BlockSpec(arr.shape, lambda i: (0, 0))

    in_specs = [stream_spec, stream_spec] + [const_spec(p) for p in flat]

    # Advisory cost model so XLA schedules the surrounding gathers sensibly.
    matmul_flops = 2 * padded_b * sum(int(w.shape[0]) * int(w.shape[1])
                                      for w in fc_ws)
    tail_flops = padded_b * (3 * f_mf + 2 * l_last + 4)
    param_bytes = sum(int(p.size) * p.dtype.itemsize for p in flat)
    cost = pl.CostEstimate(
        flops=matmul_flops + tail_flops,
        transcendentals=padded_b,
        bytes_accessed=2 * padded_b * f_tot * 2 + padded_b * 4 + param_bytes,
    )

    out = pl.pallas_call(
        kernel,
        out_shape=jax.ShapeDtypeStruct((num_blocks, tile_b), jnp.float32),
        grid_spec=pltpu.PrefetchScalarGridSpec(
            num_scalar_prefetch=0,
            grid=(num_blocks,),
            in_specs=in_specs,
            out_specs=pl.BlockSpec((1, tile_b), lambda i: (i, 0)),
        ),
        compiler_params=pltpu.CompilerParams(
            dimension_semantics=("parallel",),      # shard tiles across TCs (v7x)
            vmem_limit_bytes=48 * 1024 * 1024,      # headroom under v7x's 64 MiB
        ),
        cost_estimate=cost,
    )(u_stream, i_stream, *flat)

    return out.reshape(-1)[:batch]                  # matches rating.squeeze()


# ----------------------------------------------------------------------------
# Parameter construction (mirrors the PyTorch init).
# ----------------------------------------------------------------------------
def _xavier_uniform(key, shape, fan_in, fan_out):
    bound = jnp.sqrt(6.0 / (fan_in + fan_out))
    return jax.random.uniform(key, shape, jnp.float32, -bound, bound)


def build_params(key, num_users, num_items, num_factors, layers):
    num_factors_mlp = layers[0] // 2
    n_fc = len(layers) - 1
    keys = jax.random.split(key, 4 + n_fc + 1)

    eu_mlp = 0.01 * jax.random.normal(keys[0], (num_users, num_factors_mlp), jnp.float32)
    ei_mlp = 0.01 * jax.random.normal(keys[1], (num_items, num_factors_mlp), jnp.float32)
    eu_mf = 0.01 * jax.random.normal(keys[2], (num_users, num_factors), jnp.float32)
    ei_mf = 0.01 * jax.random.normal(keys[3], (num_items, num_factors), jnp.float32)

    # Fused per-side embedding tables (one gather per side), stored bf16
    # (dominant HBM stream); compute in-kernel is f32 everywhere on the VPU.
    user_table = jnp.concatenate([eu_mlp, eu_mf], axis=1).astype(jnp.bfloat16)
    item_table = jnp.concatenate([ei_mlp, ei_mf], axis=1).astype(jnp.bfloat16)

    fc_ws, fc_bs = [], []
    for k, (ins, outs) in enumerate(zip(layers, layers[1:])):
        fc_ws.append(_xavier_uniform(keys[4 + k], (ins, outs), ins, outs))
        fc_bs.append(jnp.zeros((outs,), jnp.float32))

    d_aff = layers[-1] + num_factors
    aff_w = _xavier_uniform(keys[4 + n_fc], (1, d_aff), d_aff, 1)  # (1, d_aff)
    aff_b = jnp.zeros((1,), jnp.float32)

    # TODO(synk): dropout is a constructor arg of NeuCF but is never applied in
    # its forward(), so it is intentionally not implemented here.
    return (user_table, item_table, fc_ws, fc_bs, aff_w, aff_b)


# ----------------------------------------------------------------------------
# Pure-JAX reference (same math; mirrors the bf16 tables and bf16 first layer).
# ----------------------------------------------------------------------------
def reference_forward(user_indices, item_indices, params):
    (user_table, item_table, fc_ws, fc_bs, aff_w, aff_b) = params
    f_mlp = fc_ws[0].shape[0] // 2

    u = user_table[user_indices].astype(jnp.float32)
    i = item_table[item_indices].astype(jnp.float32)
    u_mlp, u_mf = u[:, :f_mlp], u[:, f_mlp:]
    i_mlp, i_mf = i[:, :f_mlp], i[:, f_mlp:]

    mlp_vec = jnp.concatenate([u_mlp, i_mlp], axis=-1)
    mf_vec = u_mf * i_mf

    # Mirror the kernel's bf16 first-layer weights (bf16 into the MXU).
    w0 = fc_ws[0].astype(jnp.bfloat16).astype(jnp.float32)
    h = jnp.maximum(mlp_vec @ w0 + fc_bs[0], 0.0)
    for w, b in zip(fc_ws[1:], fc_bs[1:]):
        h = jnp.maximum(h @ w + b, 0.0)

    vec = jnp.concatenate([h, mf_vec], axis=-1)
    logits = vec @ aff_w.reshape(-1, 1) + aff_b
    return jnp.squeeze(jax.nn.sigmoid(logits))


if __name__ == "__main__":
    # Small shapes consistent with the module's forward.
    num_users = 10
    num_items = 12
    num_factors = 8          # MF embedding size
    layers = [32, 16, 8]     # num_factors_mlp = 16
    batch = 8

    key = jax.random.PRNGKey(0)
    pkey, ukey, ikey = jax.random.split(key, 3)
    params = build_params(pkey, num_users, num_items, num_factors, layers)

    user_indices = jax.random.randint(ukey, (batch,), 0, num_users)
    item_indices = jax.random.randint(ikey, (batch,), 0, num_items)

    out = neucf_forward(user_indices, item_indices, params, tile_b=128)
    out = jax.block_until_ready(out)

    ref = reference_forward(user_indices, item_indices, params)
    assert out.shape == (batch,), out.shape
    assert jnp.allclose(out, ref, atol=3e-3, rtol=3e-3), (out, ref)

    print("KERNEL_OK")
</pallas_src>

<mosaic_0001>
module attributes {stable_mosaic.version = 11 : i64} {
  func.func @_neucf_kernel(%arg0: i32, %arg1: memref<24x128xbf16, #tpu.memory_space<vmem>>, %arg2: memref<24x128xbf16, #tpu.memory_space<vmem>>, %arg3: memref<16x16xbf16, #tpu.memory_space<vmem>>, %arg4: memref<16x16xbf16, #tpu.memory_space<vmem>>, %arg5: memref<16x1xf32, #tpu.memory_space<vmem>>, %arg6: memref<8x16xf32, #tpu.memory_space<vmem>>, %arg7: memref<8x1xf32, #tpu.memory_space<vmem>>, %arg8: memref<8x1xf32, #tpu.memory_space<vmem>>, %arg9: memref<8x1xf32, #tpu.memory_space<vmem>>, %arg10: memref<1x1xf32, #tpu.memory_space<vmem>>, %arg11: memref<1x128xf32, #tpu.memory_space<vmem>>) attributes {dimension_semantics = [#tpu.dimension_semantics<parallel>], iteration_bounds = array<i64: 1>, scalar_prefetch = 0 : i64, scratch_operands = 0 : i64, tpu.core_type = #tpu.core_type<tc>, window_params = [{transform_indices = @transform_0, window_bounds = array<i64: 24, 128>}, {transform_indices = @transform_1, window_bounds = array<i64: 24, 128>}, {pipeline_mode = #tpu.pipeline_mode<synchronous>, transform_indices = @transform_2, window_bounds = array<i64: 16, 16>}, {pipeline_mode = #tpu.pipeline_mode<synchronous>, transform_indices = @transform_3, window_bounds = array<i64: 16, 16>}, {pipeline_mode = #tpu.pipeline_mode<synchronous>, transform_indices = @transform_4, window_bounds = array<i64: 16, 1>}, {pipeline_mode = #tpu.pipeline_mode<synchronous>, transform_indices = @transform_5, window_bounds = array<i64: 8, 16>}, {pipeline_mode = #tpu.pipeline_mode<synchronous>, transform_indices = @transform_6, window_bounds = array<i64: 8, 1>}, {pipeline_mode = #tpu.pipeline_mode<synchronous>, transform_indices = @transform_7, window_bounds = array<i64: 8, 1>}, {pipeline_mode = #tpu.pipeline_mode<synchronous>, transform_indices = @transform_8, window_bounds = array<i64: 8, 1>}, {pipeline_mode = #tpu.pipeline_mode<synchronous>, transform_indices = @transform_9, window_bounds = array<i64: 1, 1>}, {transform_indices = @transform_10, window_bounds = array<i64: 1, 128>}]} {
    %c0 = arith.constant 0 : index
    %c0_0 = arith.constant 0 : index
    %0 = vector.load %arg1[%c0, %c0_0] : memref<24x128xbf16, #tpu.memory_space<vmem>>, vector<16x128xbf16>
    %c0_1 = arith.constant 0 : index
    %c0_2 = arith.constant 0 : index
    %1 = vector.load %arg2[%c0_1, %c0_2] : memref<24x128xbf16, #tpu.memory_space<vmem>>, vector<16x128xbf16>
    %c16 = arith.constant 16 : index
    %c0_3 = arith.constant 0 : index
    %2 = vector.load %arg1[%c16, %c0_3] : memref<24x128xbf16, #tpu.memory_space<vmem>>, vector<8x128xbf16>
    %3 = arith.extf %2 : vector<8x128xbf16> to vector<8x128xf32>
    %c16_4 = arith.constant 16 : index
    %c0_5 = arith.constant 0 : index
    %4 = vector.load %arg2[%c16_4, %c0_5] : memref<24x128xbf16, #tpu.memory_space<vmem>>, vector<8x128xbf16>
    %5 = arith.extf %4 : vector<8x128xbf16> to vector<8x128xf32>
    %c0_6 = arith.constant 0 : index
    %c0_7 = arith.constant 0 : index
    %6 = vector.load %arg3[%c0_6, %c0_7] : memref<16x16xbf16, #tpu.memory_space<vmem>>, vector<16x16xbf16>
    %c0_8 = arith.constant 0 : index
    %c0_9 = arith.constant 0 : index
    %7 = vector.load %arg4[%c0_8, %c0_9] : memref<16x16xbf16, #tpu.memory_space<vmem>>, vector<16x16xbf16>
    %c0_10 = arith.constant 0 : index
    %c0_11 = arith.constant 0 : index
    %8 = vector.load %arg5[%c0_10, %c0_11] : memref<16x1xf32, #tpu.memory_space<vmem>>, vector<16x1xf32>
    %cst = arith.constant dense<0.000000e+00> : vector<16x128xf32>
    %9 = tpu.matmul %6, %0, %cst {dimension_numbers = #tpu.dot_dimension_numbers<[1], [0], [0], [1], [0, 0, 1, 1], [], []>} : vector<16x16xbf16>, vector<16x128xbf16>, vector<16x128xf32> -> vector<16x128xf32>
    %cst_12 = arith.constant dense<0.000000e+00> : vector<16x128xf32>
    %10 = tpu.matmul %7, %1, %cst_12 {dimension_numbers = #tpu.dot_dimension_numbers<[1], [0], [0], [1], [0, 0, 1, 1], [], []>} : vector<16x16xbf16>, vector<16x128xbf16>, vector<16x128xf32> -> vector<16x128xf32>
    %11 = arith.addf %9, %10 : vector<16x128xf32>
    %12 = vector.broadcast %8 : vector<16x1xf32> to vector<16x128xf32>
    %13 = arith.addf %11, %12 : vector<16x128xf32>
    %cst_13 = arith.constant 0.000000e+00 : f32
    %14 = vector.broadcast %cst_13 : f32 to vector<16x128xf32>
    %15 = arith.maximumf %13, %14 : vector<16x128xf32>
    %c0_14 = arith.constant 0 : index
    %c0_15 = arith.constant 0 : index
    %16 = vector.load %arg6[%c0_14, %c0_15] : memref<8x16xf32, #tpu.memory_space<vmem>>, vector<8x16xf32>
    %c0_16 = arith.constant 0 : index
    %c0_17 = arith.constant 0 : index
    %17 = vector.load %arg7[%c0_16, %c0_17] : memref<8x1xf32, #tpu.memory_space<vmem>>, vector<8x1xf32>
    %cst_18 = arith.constant dense<0.000000e+00> : vector<8x128xf32>
    %18 = tpu.matmul %16, %15, %cst_18 {dimension_numbers = #tpu.dot_dimension_numbers<[1], [0], [0], [1], [0, 0, 1, 1], [], []>} : vector<8x16xf32>, vector<16x128xf32>, vector<8x128xf32> -> vector<8x128xf32>
    %19 = vector.broadcast %17 : vector<8x1xf32> to vector<8x128xf32>
    %20 = arith.addf %18, %19 : vector<8x128xf32>
    %cst_19 = arith.constant 0.000000e+00 : f32
    %21 = vector.broadcast %cst_19 : f32 to vector<8x128xf32>
    %22 = arith.maximumf %20, %21 : vector<8x128xf32>
    %23 = arith.mulf %3, %5 : vector<8x128xf32>
    %c0_20 = arith.constant 0 : index
    %c0_21 = arith.constant 0 : index
    %24 = vector.load %arg8[%c0_20, %c0_21] : memref<8x1xf32, #tpu.memory_space<vmem>>, vector<8x1xf32>
    %c0_22 = arith.constant 0 : index
    %c0_23 = arith.constant 0 : index
    %25 = vector.load %arg9[%c0_22, %c0_23] : memref<8x1xf32, #tpu.memory_space<vmem>>, vector<8x1xf32>
    %c0_24 = arith.constant 0 : index
    %c0_25 = arith.constant 0 : index
    %26 = vector.load %arg10[%c0_24, %c0_25] : memref<1x1xf32, #tpu.memory_space<vmem>>, vector<1x1xf32>
    %27 = vector.broadcast %24 : vector<8x1xf32> to vector<8x128xf32>
    %28 = arith.mulf %22, %27 : vector<8x128xf32>
    %cst_26 = arith.constant dense<0.000000e+00> : vector<128xf32>
    %29 = vector.multi_reduction <add>, %28, %cst_26 [0] : vector<8x128xf32> to vector<128xf32>
    %30 = vector.shape_cast %29 : vector<128xf32> to vector<1x128xf32>
    %31 = vector.broadcast %25 : vector<8x1xf32> to vector<8x128xf32>
    %32 = arith.mulf %23, %31 : vector<8x128xf32>
    %cst_27 = arith.constant dense<0.000000e+00> : vector<128xf32>
    %33 = vector.multi_reduction <add>, %32, %cst_27 [0] : vector<8x128xf32> to vector<128xf32>
    %34 = vector.shape_cast %33 : vector<128xf32> to vector<1x128xf32>
    %35 = arith.addf %30, %34 : vector<1x128xf32>
    %36 = vector.broadcast %26 : vector<1x1xf32> to vector<1x128xf32>
    %37 = arith.addf %35, %36 : vector<1x128xf32>
    %38 = arith.negf %37 : vector<1x128xf32>
    %39 = math.exp %38 : vector<1x128xf32>
    %cst_28 = arith.constant 1.000000e+00 : f32
    %40 = vector.broadcast %cst_28 : f32 to vector<1x128xf32>
    %41 = arith.addf %40, %39 : vector<1x128xf32>
    %42 = arith.divf %40, %41 : vector<1x128xf32>
    %c0_29 = arith.constant 0 : index
    %c0_30 = arith.constant 0 : index
    %43 = vector.load %arg11[%c0_29, %c0_30] : memref<1x128xf32, #tpu.memory_space<vmem>>, vector<1x128xf32>
    tpu.vector_store %arg11[%c0_29, %c0_30], %42 {strides = array<i32>} : memref<1x128xf32, #tpu.memory_space<vmem>>, vector<1x128xf32>,
    return
  }
  func.func @transform_0(%arg0: i32) -> (i32, i32) {
    %c0_i32 = arith.constant 0 : i32
    %c0_i32_0 = arith.constant 0 : i32
    return %c0_i32, %arg0 : i32, i32
  }
  func.func @transform_1(%arg0: i32) -> (i32, i32) {
    %c0_i32 = arith.constant 0 : i32
    %c0_i32_0 = arith.constant 0 : i32
    return %c0_i32, %arg0 : i32, i32
  }
  func.func @transform_2(%arg0: i32) -> (i32, i32) {
    %c0_i32 = arith.constant 0 : i32
    %c0_i32_0 = arith.constant 0 : i32
    %c0_i32_1 = arith.constant 0 : i32
    return %c0_i32, %c0_i32_0 : i32, i32
  }
  func.func @transform_3(%arg0: i32) -> (i32, i32) {
    %c0_i32 = arith.constant 0 : i32
    %c0_i32_0 = arith.constant 0 : i32
    %c0_i32_1 = arith.constant 0 : i32
    return %c0_i32, %c0_i32_0 : i32, i32
  }
  func.func @transform_4(%arg0: i32) -> (i32, i32) {
    %c0_i32 = arith.constant 0 : i32
    %c0_i32_0 = arith.constant 0 : i32
    %c0_i32_1 = arith.constant 0 : i32
    return %c0_i32, %c0_i32_0 : i32, i32
  }
  func.func @transform_5(%arg0: i32) -> (i32, i32) {
    %c0_i32 = arith.constant 0 : i32
    %c0_i32_0 = arith.constant 0 : i32
    %c0_i32_1 = arith.constant 0 : i32
    return %c0_i32, %c0_i32_0 : i32, i32
  }
  func.func @transform_6(%arg0: i32) -> (i32, i32) {
    %c0_i32 = arith.constant 0 : i32
    %c0_i32_0 = arith.constant 0 : i32
    %c0_i32_1 = arith.constant 0 : i32
    return %c0_i32, %c0_i32_0 : i32, i32
  }
  func.func @transform_7(%arg0: i32) -> (i32, i32) {
    %c0_i32 = arith.constant 0 : i32
    %c0_i32_0 = arith.constant 0 : i32
    %c0_i32_1 = arith.constant 0 : i32
    return %c0_i32, %c0_i32_0 : i32, i32
  }
  func.func @transform_8(%arg0: i32) -> (i32, i32) {
    %c0_i32 = arith.constant 0 : i32
    %c0_i32_0 = arith.constant 0 : i32
    %c0_i32_1 = arith.constant 0 : i32
    return %c0_i32, %c0_i32_0 : i32, i32
  }
  func.func @transform_9(%arg0: i32) -> (i32, i32) {
    %c0_i32 = arith.constant 0 : i32
    %c0_i32_0 = arith.constant 0 : i32
    %c0_i32_1 = arith.constant 0 : i32
    return %c0_i32, %c0_i32_0 : i32, i32
  }
  func.func @transform_10(%arg0: i32) -> (i32, i32) {
    %c0_i32 = arith.constant 0 : i32
    %c0_i32_0 = arith.constant 0 : i32
    return %arg0, %c0_i32 : i32, i32
  }
}

</mosaic_0001>

<bundles_post_ra>
// kernel: tpu_custom_call.1
= control target key start
LH: loop header
LB: loop body
LE: loop exit
PB: predicated region body
PF: predicated region fallthrough
CT: control target
= control target key end

     0   :  { %s512_s0 = inlined_call_operand.vmem [shape: bf16[24,128], index: 0, kind: input, shape index: {}]   ;;  %s513_s1 = inlined_call_operand.vmem [shape: bf16[24,128], index: 1, kind: input, shape index: {}]   ;;  %s514_s2 = inlined_call_operand.vmem [shape: bf16[16,16], index: 2, kind: input, shape index: {}]   ;;  %s515_s3 = inlined_call_operand.vmem [shape: bf16[16,16], index: 3, kind: input, shape index: {}]   ;;  %s516_s4 = inlined_call_operand.vmem [shape: f32[16,1], index: 4, kind: input, shape index: {}]   ;;  %s517_s5 = inlined_call_operand.vmem [shape: f32[8,16], index: 5, kind: input, shape index: {}]   ;;  %s518_s6 = inlined_call_operand.vmem [shape: f32[8,1], index: 6, kind: input, shape index: {}]   ;;  %s519_s7 = inlined_call_operand.vmem [shape: f32[8,1], index: 7, kind: input, shape index: {}]   ;;  %s520_s8 = inlined_call_operand.vmem [shape: f32[8,1], index: 8, kind: input, shape index: {}]   ;;  %s521_s9 = inlined_call_operand.<no memory space> [shape: f32[1,1], index: 9, kind: input, shape index: {}]   ;;  %s522_s10 = inlined_call_operand.hbm [shape: f32[1,128], index: 10, kind: output, shape index: {}]  }
   0x1   :  { %v15_v0 = vstv %s521_s9 }
   0x2   :  { %16 = vst [vmem:[#allocation2] sm:$0x1] %v15_v0 }
   0x3   :  { %v363_v1 = vld [vmem:[%s513_s1] sm:$0xff]   ;;  %v395_v2 = vmov 0.0   ;;  %vm396_vm0 = vmmov 0   ;;  %vm64_vm1 = vcmask 130048   ;;  %v397_v6 = vmov 0  }
   0x4   :  { %334 = vmatprep.subr.bf16.mxu0 %v395_v2  ;;  %340 = vmatprep.subr.bf16.mxu1 %v395_v2  ;;  %v364_v3 = vld [vmem:[%s512_s0] sm:$0xff]  }
   0x5   :  { %335 = vmatpush3.bf16.msra.mxu0 %v363_v1  ;;  %336 = vmatprep.mubr.msk.bf16.mxu0 %vm396_vm0, %v395_v2  ;;  %v365_v4 = vld [vmem:[%s515_s3] sm:$0xff]  }
   0x6   :  { %341 = vmatpush3.bf16.msra.mxu1 %v364_v3  ;;  %342 = vmatprep.mubr.msk.bf16.mxu1 %vm396_vm0, %v395_v2  ;;  %v366_v5 = vld [vmem:[%s514_s2] sm:$0xff]  }
   0x7   :  { %361 = vset.pattern.permute.xlu0 %v397_v6  ;;  %v51_v7 = vld [vmem:[%s516_s4] sm:$0xff]  ;;  %362 = vset.pattern.permute.xlu1 %v397_v6 }
   0x8   :  { %337 = vmatmul.mubr.msk.bf16.vlgmr.msra.gmra.mrb[0].mxu0 %vm64_vm1, %v365_v4  ;;  %166 = vperm.xlu0 %361, %v51_v7  }
   0x9   :  { %17 = vsyncpa [#allocation4], 0  ;;  %343 = vmatmul.mubr.msk.bf16.vlgmr.msra.gmra.mrb[0].mxu1 %vm64_vm1, %v366_v5  ;;  %v52_v8 = vld [vmem:[%s516_s4 + $0x8] sm:$0xff]  ;;  %350 = vmatprep.mubr.msk.f32.mxu0 %vm396_vm0, %v395_v2  ;;  %v261_v9 = vld [vmem:[%s520_s8] sm:$0xff]  ;;  %v398_v10 = vmov 0.0|0.0   ;;  %v293_v50 = vlaneseq }
   0xa   :  { %353 = vmatprep.subr.bf16.mxu0 %v398_v10  ;;  %v179_v11 = vld [vmem:[%s518_s6] sm:$0xff]  ;;  %v43_v32 = vld [vmem:[%s512_s0 + $0x8] sm:$0xf]  ;;  %s399_s0 = smov [#allocation3]  }
   0xb   :  { %182 = vperm.xlu1 %362, %v179_v11   ;;  %v260_v12 = vld [vmem:[%s519_s7] sm:$0xff]  ;;  %v45_v33 = vld [vmem:[%s513_s1 + $0x8] sm:$0xf]  ;;  %v44_v34 = vunpack.c.l.bf16 %v43_v32  ;;  %v294_v54 = vshrl.u32 %v293_v50, 7  ;;  %s311_s1 = sshll.u32 %s399_s0, 4  ;;  %s312_s1 = int_to_ptr.vmem [resolvable:$true] %s311_s1 }
   0xc   :  { %171 = vperm.xlu0 %361, %v52_v8   ;;  %v262_v13 = vld [vmem:[#allocation2] sm:$0x1]  ;;  %v46_v35 = vunpack.c.l.bf16 %v45_v33  ;;  %s375_s12 = scalar_lea.vmem %s312_s1, 32  ;;  %p376_p1 = scmp.lt.s32.totalorder %s312_s1, %s312_s1 }
   0xd   :  { %v178_v31 = vld [vmem:[%s517_s5] sm:$0xff]  ;;  %v295_v58 = vsub.s32 0, %v294_v54  ;;  %s371_s5 = scalar_lea.vmem %s312_s1, 16 }
   0xe   :  { %v259_v36 = vmul.f32 %v46_v35, %v44_v34  ;;  %p372_p0 = scmp.ne.s32.totalorder %s312_s1, %s371_s5  ;;  %p377_p2 = scmp.lt.s32.totalorder %s375_s12, %s371_s5 }
   0xf   :  { %265 = vperm.xlu1 %362, %v260_v12  }
  0x10   :  { %277 = vperm.xlu0 %361, %v261_v9   ;;  %p378_p3 = por %p377_p2, %p376_p1 }
  0x12   :  { %p379_p4 = pnand %p378_p3, %p372_p0 }
  0x13   :  { %290 = vperm.xlu1 %362, %v262_v13  }
  0x87   :  { %v167_v14 = vpop.permute.xlu0 %166 }
  0x8a   :  { %v183_v40 = vpop.permute.xlu1 %182 }
  0x8b   :  { %v172_v26 = vpop.permute.xlu0 %171 }
  0x8e   :  { %v266_v46 = vpop.permute.xlu1 %265 }
  0x8f   :  { %v278_v37 = vpop.permute.xlu0 %277 }
  0x90   :  { %v280_v38 = vmul.f32 %v278_v37, %v259_v36 }
  0x92   :  { %v281_v39 = vrot.slane %v280_v38, 4  ;;  %v291_v59 = vpop.permute.xlu1 %290 }
  0x93   :  { %v296_v63 = vrot.slane %v291_v59, %v295_v58 }
  0x94   :  { %v282_v42 = vadd.f32 %v281_v39, %v280_v38 }
  0x96   :  { %v283_v47 = vrot.slane %v282_v42, 2 }
  0x98   :  { %v284_v51 = vadd.f32 %v283_v47, %v282_v42 }
  0x9a   :  { %v285_v55 = vrot.slane %v284_v51, 1 }
  0x9c   :  { %v286_v61 = vadd.f32 %v285_v55, %v284_v51 }
  0xdb   :  { %v102_v15 = vpop.f32.mrb[0].mxu0 }
  0xdc   :  { %v157_v16 = vpop.f32.mrb[0].mxu1  ;;  %v338_v17 = vpop.f32.mrb[1].mxu0 }
  0xdd   :  { %v158_v18 = vadd.f32 %v157_v16, %v102_v15  ;;  %v344_v19 = vpop.f32.mrb[1].mxu1  ;;  %v105_v20 = vpop.f32.mrb[2].mxu0 }
  0xde   :  { %v160_v21 = vpop.f32.mrb[2].mxu1  ;;  %v339_v22 = vpop.f32.mrb[3].mxu0 }
  0xdf   :  { %v174_v23 = vadd.f32 %v167_v14, %v158_v18  ;;  %v161_v24 = vadd.f32 %v160_v21, %v105_v20  ;;  %v345_v25 = vpop.f32.mrb[3].mxu1 }
  0xe1   :  { %v175_v27 = vadd.f32 %v172_v26, %v161_v24  ;;  %v176_v28 = vmax.f32 %v174_v23, 0.0 }
  0xe3   :  { %v177_v29 = vmax.f32 %v175_v27, 0.0 }
  0xe5   :  { %v354_v30 = vpack.c.bf16 %v177_v29, %v176_v28 }
  0xe7   :  { %355 = vmatpush3.bf16.msra.mxu0 %v354_v30 }
  0xea   :  { %351 = vmatmul.mubr.msk.f32.vlgmr.msra.gmra.mrb[4].mxu0 %vm64_vm1, %v178_v31 }
 0x1bd   :  { %v254_v41 = vpop.f32.mrb[4].mxu0 }
 0x1be   :  { %v255_v43 = vadd.f32 %v254_v41, %v183_v40  ;;  %v352_v44 = vpop.f32.mrb[5].mxu0 }
 0x1c0   :  { %v258_v45 = vmax.f32 %v255_v43, 0.0 }
 0x1c2   :  { %v268_v48 = vmul.f32 %v266_v46, %v258_v45 }
 0x1c4   :  { %v269_v49 = vrot.slane %v268_v48, 4 }
 0x1c6   :  { %v270_v52 = vadd.f32 %v269_v49, %v268_v48 }
 0x1c8   :  { %v271_v53 = vrot.slane %v270_v52, 2 }
 0x1ca   :  { %v272_v56 = vadd.f32 %v271_v53, %v270_v52 }
 0x1cc   :  { %v273_v57 = vrot.slane %v272_v56, 1 }
 0x1ce   :  { %v274_v60 = vadd.f32 %v273_v57, %v272_v56 }
 0x1d0   :  { %v287_v62 = vadd.f32 %v286_v61, %v274_v60 }
 0x1d2   :  { %v297_v0 = vadd.f32 %v296_v63, %v287_v62 }
 0x1d4   :  { %v326_v1 = vmul.f32 -1.442695, %v297_v0 }
 0x1d6   :  { %367 = vpow2.f32 %v326_v1 }
 0x1e0   :  { %v368_v2 = vpop.eup %367 }
 0x1e1   :  { %v301_v3 = vadd.f32 1.0, %v368_v2 }
 0x1e3   :  { %369 = vrcp.f32 %v301_v3 }
 0x1ed   :  { %v370_v4 = vpop.eup %369 }
 0x1ee   :  { %304 = vst [vmem:[#allocation3] sm:$0x1] %v370_v4 }
 0x1ef   :  { %382 = shalt.err (!%p379_p4)
}
 0x1f0   :  { %s383_s15 = scalar_lea.hbm %s522_s10, 16 }
 0x1f1   :  { %p384_p5 = scmp.ne.s32.totalorder %s522_s10, %s383_s15  ;;  %p387_p6 = scmp.lt.u32.totalorder %s383_s15, %s522_s10 }
 0x1f3   :  { %p389_p7 = pnand %p387_p6, %p384_p5 }
 0x1f5   :  { %392 = shalt.err (!%p389_p7)
}
 0x1f6   :  { %314 = dma.vmem_to_hbm [thread:$0]  %s312_s1, 16, %s522_s10, [#allocation4]  }
 0x1f7   :  { %393 = dma.done.wait [#allocation4], 16  }
 0x1f8   :  { %394 = vsyncadd [#allocation4], 4294967280 }
 0x1f9   :  { %318 = vsyncpa [#allocation4], 1 }

</bundles_post_ra>
